<compile_context>
chip_gen: v6e
topology: v6e:2x2x1
jax: 0.10.0
libtpu: 0.0.40
codegen_flags: <defaults>
</compile_context>

<pallas_src>
import jax
import jax.numpy as jnp
from jax.experimental import pallas as pl
from jax.experimental.pallas import tpu as pltpu


def _mish_kernel(x_ref, o_ref):
    x = x_ref[...].astype(jnp.float32)
    # mish(x) = x * tanh(softplus(x)).
    # With t = exp(-|x|) (always in (0, 1], no overflow):
    #   x >= 0: tanh(softplus(x)) = (1 + 2t) / (1 + 2t + 2t^2)
    #   x <  0: tanh(softplus(x)) = (2t + t^2) / (2 + 2t + t^2)
    t = jnp.exp(-jnp.abs(x))
    t2 = t * t
    pos = x >= 0.0
    num = jnp.where(pos, 1.0 + 2.0 * t, 2.0 * t + t2)
    den = jnp.where(pos, 1.0 + 2.0 * t + 2.0 * t2, 2.0 + 2.0 * t + t2)
    y = x * num * pl.reciprocal(den, approx=False)
    o_ref[...] = y.astype(o_ref.dtype)


def mish(x, *, target_block_bytes=2 << 20):
    """Mish activation via Pallas. x: any shape (e.g. NCHW), any float dtype."""
    orig_shape = x.shape
    dtype = x.dtype
    n = x.size
    if n == 0:
        return x

    itemsize = jnp.dtype(dtype).itemsize
    sub_min = max(8, 32 // itemsize)   # 8 for f32, 16 for bf16, 32 for int8/fp8

    # Prefer a wide lane width that divides n exactly (pure reshape, no copy).
    lanes = None
    for cand in (1024, 512, 256, 128):
        if n % cand == 0:
            lanes = cand
            break

    x_flat = jnp.reshape(x, (-1,))
    n_pad = 0
    if lanes is None:
        # Ragged size: pad only the flat tail (< lanes elements of real pad).
        lanes = 1024
        n_pad = (-n) % lanes
        x_flat = jnp.concatenate([x_flat, jnp.zeros((n_pad,), dtype=dtype)])

    rows = x_flat.size // lanes
    x2d = x_flat.reshape(rows, lanes)

    # Large, sublane-aligned block rows (~target_block_bytes per block).
    tr = max(sub_min, target_block_bytes // (lanes * itemsize))
    tr = (tr // sub_min) * sub_min
    if tr >= rows:
        block_rows = rows              # single block spanning the full array
    else:
        block_rows = tr                # ragged last block handled by cdiv grid
    grid = (pl.cdiv(rows, block_rows),)

    out2d = pl.pallas_call(
        _mish_kernel,
        out_shape=jax.ShapeDtypeStruct((rows, lanes), dtype),
        grid_spec=pltpu.PrefetchScalarGridSpec(
            num_scalar_prefetch=0,
            grid=grid,
            in_specs=[pl.BlockSpec((block_rows, lanes), lambda i: (i, 0))],
            out_specs=pl.BlockSpec((block_rows, lanes), lambda i: (i, 0)),
        ),
        compiler_params=pltpu.CompilerParams(
            dimension_semantics=("parallel",)),
    )(x2d)

    out_flat = out2d.reshape(-1)
    if n_pad:
        out_flat = out_flat[:n]
    return out_flat.reshape(orig_shape)


if __name__ == "__main__":
    key = jax.random.PRNGKey(0)

    # Primary check: NCHW input like the PyTorch module would see.
    x = jax.random.normal(key, (2, 4, 16, 16), dtype=jnp.float32)
    y = mish(x)
    jax.block_until_ready(y)
    ref = x * jnp.tanh(jax.nn.softplus(x))
    assert y.shape == x.shape and y.dtype == x.dtype
    assert jnp.max(jnp.abs(y - ref)) < 1e-5

    # Secondary check: ragged size exercises the tail-pad fallback path.
    x2 = jax.random.normal(jax.random.PRNGKey(1), (3, 5, 7), dtype=jnp.float32)
    y2 = mish(x2)
    jax.block_until_ready(y2)
    ref2 = x2 * jnp.tanh(jax.nn.softplus(x2))
    assert y2.shape == x2.shape and jnp.max(jnp.abs(y2 - ref2)) < 1e-5

    print("KERNEL_OK")
</pallas_src>

<mosaic_0001>
module attributes {stable_mosaic.version = 11 : i64} {
  func.func @_mish_kernel(%arg0: i32, %arg1: memref<2x1024xf32, #tpu.memory_space<vmem>>, %arg2: memref<2x1024xf32, #tpu.memory_space<vmem>>) attributes {dimension_semantics = [#tpu.dimension_semantics<parallel>], iteration_bounds = array<i64: 1>, scalar_prefetch = 0 : i64, scratch_operands = 0 : i64, tpu.core_type = #tpu.core_type<tc>, window_params = [{transform_indices = @transform_0, window_bounds = array<i64: 2, 1024>}, {transform_indices = @transform_1, window_bounds = array<i64: 2, 1024>}]} {
    %c0 = arith.constant 0 : index
    %c0_0 = arith.constant 0 : index
    %0 = vector.load %arg1[%c0, %c0_0] : memref<2x1024xf32, #tpu.memory_space<vmem>>, vector<2x1024xf32>
    %1 = math.absf %0 : vector<2x1024xf32>
    %cst = arith.constant 0.000000e+00 : f32
    %2 = vector.broadcast %cst : f32 to vector<2x1024xf32>
    %3 = arith.subf %2, %1 : vector<2x1024xf32>
    %4 = math.exp %3 : vector<2x1024xf32>
    %5 = arith.mulf %4, %4 : vector<2x1024xf32>
    %cst_1 = arith.constant 0.000000e+00 : f32
    %6 = vector.broadcast %cst_1 : f32 to vector<2x1024xf32>
    %7 = arith.cmpf oge, %0, %6 : vector<2x1024xf32>
    %cst_2 = arith.constant 2.000000e+00 : f32
    %8 = vector.broadcast %cst_2 : f32 to vector<2x1024xf32>
    %9 = arith.mulf %8, %4 : vector<2x1024xf32>
    %cst_3 = arith.constant 1.000000e+00 : f32
    %10 = vector.broadcast %cst_3 : f32 to vector<2x1024xf32>
    %11 = arith.addf %10, %9 : vector<2x1024xf32>
    %cst_4 = arith.constant 2.000000e+00 : f32
    %12 = vector.broadcast %cst_4 : f32 to vector<2x1024xf32>
    %13 = arith.mulf %12, %4 : vector<2x1024xf32>
    %14 = arith.addf %13, %5 : vector<2x1024xf32>
    %15 = arith.select %7, %11, %14 : vector<2x1024xi1>, vector<2x1024xf32>
    %cst_5 = arith.constant 2.000000e+00 : f32
    %16 = vector.broadcast %cst_5 : f32 to vector<2x1024xf32>
    %17 = arith.mulf %16, %4 : vector<2x1024xf32>
    %cst_6 = arith.constant 1.000000e+00 : f32
    %18 = vector.broadcast %cst_6 : f32 to vector<2x1024xf32>
    %19 = arith.addf %18, %17 : vector<2x1024xf32>
    %cst_7 = arith.constant 2.000000e+00 : f32
    %20 = vector.broadcast %cst_7 : f32 to vector<2x1024xf32>
    %21 = arith.mulf %20, %5 : vector<2x1024xf32>
    %22 = arith.addf %19, %21 : vector<2x1024xf32>
    %cst_8 = arith.constant 2.000000e+00 : f32
    %23 = vector.broadcast %cst_8 : f32 to vector<2x1024xf32>
    %24 = arith.mulf %23, %4 : vector<2x1024xf32>
    %cst_9 = arith.constant 2.000000e+00 : f32
    %25 = vector.broadcast %cst_9 : f32 to vector<2x1024xf32>
    %26 = arith.addf %25, %24 : vector<2x1024xf32>
    %27 = arith.addf %26, %5 : vector<2x1024xf32>
    %28 = arith.select %7, %22, %27 : vector<2x1024xi1>, vector<2x1024xf32>
    %29 = arith.mulf %0, %15 : vector<2x1024xf32>
    %30 = tpu.reciprocal %28 : vector<2x1024xf32> -> vector<2x1024xf32>
    %31 = arith.mulf %29, %30 : vector<2x1024xf32>
    %c0_10 = arith.constant 0 : index
    %c0_11 = arith.constant 0 : index
    %32 = vector.load %arg2[%c0_10, %c0_11] : memref<2x1024xf32, #tpu.memory_space<vmem>>, vector<2x1024xf32>
    tpu.vector_store %arg2[%c0_10, %c0_11], %31 {strides = array<i32>} : memref<2x1024xf32, #tpu.memory_space<vmem>>, vector<2x1024xf32>,
    return
  }
  func.func @transform_0(%arg0: i32) -> (i32, i32) {
    %c0_i32 = arith.constant 0 : i32
    %c0_i32_0 = arith.constant 0 : i32
    return %arg0, %c0_i32 : i32, i32
  }
  func.func @transform_1(%arg0: i32) -> (i32, i32) {
    %c0_i32 = arith.constant 0 : i32
    %c0_i32_0 = arith.constant 0 : i32
    return %arg0, %c0_i32 : i32, i32
  }
}

</mosaic_0001>

<bundles_post_ra>
// kernel: tpu_custom_call.1
= control target key start
LH: loop header
LB: loop body
LE: loop exit
PB: predicated region body
PF: predicated region fallthrough
CT: control target
= control target key end

     0   :  { %6 = vsyncpa [#allocation3], 0  ;;  %s148_s0 = inlined_call_operand.hbm [shape: f32[2,1024], index: 0, kind: input, shape index: {}]   ;;  %s149_s1 = inlined_call_operand.hbm [shape: f32[2,1024], index: 1, kind: output, shape index: {}]  }
   0x1   :  { %7 = vsyncpa [#allocation4], 0  ;;  %s130_s6 = smov [#allocation2]  }
   0x2   :  { %s14_s7 = sshll.u32 %s130_s6, 4  ;;  %s15_s7 = int_to_ptr.vmem [resolvable:$true] %s14_s7 }
   0x3   :  { %s94_s8 = scalar_lea.vmem %s15_s7, 256  ;;  %p99_p1 = scmp.lt.s32.totalorder %s15_s7, %s15_s7 }
   0x4   :  { %p95_p0 = scmp.ne.s32.totalorder %s15_s7, %s94_s8  ;;  %p100_p2 = scmp.lt.s32.totalorder %s94_s8, %s94_s8 }
   0x6   :  { %p101_p3 = por %p100_p2, %p99_p1 }
   0x8   :  { %p102_p4 = pnand %p101_p3, %p95_p0 }
   0xa   :  { %105 = shalt.err (!%p102_p4)
}
   0xb   :  { %17 = dma.hbm_to_vmem [thread:$0]  %s148_s0, 256, %s15_s7, [#allocation3]  }
   0xc   :  { %126 = dma.done.wait [#allocation3], 256  }
   0xd   :  { %127 = vsyncadd [#allocation3], 4294967040  ;;  %v21_v0 = vld [vmem:[#allocation2] sm:$0xff]  ;;  %v22_v1 = vld [vmem:[#allocation2 + $0x8] sm:$0xff]  ;;  %s131_s0 = smov [#allocation5]  }
   0xe   :  { %v23_v2 = vand.u32 2147483647, %v21_v0  ;;  %v24_v3 = vand.u32 2147483647, %v22_v1  ;;  %vm33_vm0 = vcmp.ge.f32.partialorder %v21_v0, 0.0  ;;  %vm34_vm1 = vcmp.ge.f32.partialorder %v22_v1, 0.0 }
   0xf   :  { %s67_s11 = sshll.u32 %s131_s0, 4  ;;  %s68_s11 = int_to_ptr.vmem [resolvable:$true] %s67_s11 }
  0x10   :  { %v25_v4 = vsub.f32 0.0, %v23_v2  ;;  %v26_v5 = vsub.f32 0.0, %v24_v3  ;;  %s106_s12 = scalar_lea.vmem %s68_s11, 256  ;;  %p111_p6 = scmp.lt.s32.totalorder %s68_s11, %s68_s11 }
  0x11   :  { %p107_p5 = scmp.ne.s32.totalorder %s68_s11, %s106_s12  ;;  %p112_p7 = scmp.lt.s32.totalorder %s106_s12, %s106_s12 }
  0x12   :  { %v27_v6 = vmul.f32 1.442695, %v25_v4  ;;  %v29_v7 = vmul.f32 1.442695, %v26_v5 }
  0x13   :  { %p113_p8 = por %p112_p7, %p111_p6 }
  0x14   :  { %78 = vpow2.f32 %v27_v6 }
  0x15   :  { %80 = vpow2.f32 %v29_v7  ;;  %p114_p9 = pnand %p113_p8, %p107_p5 }
  0x21   :  { %v79_v8 = vpop.eup %78 }
  0x22   :  { %v81_v9 = vpop.eup %80  ;;  %v31_v10 = vmul.f32 %v79_v8, %v79_v8  ;;  %v35_v11 = vmul.f32 2.0, %v79_v8 }
  0x23   :  { %v32_v12 = vmul.f32 %v81_v9, %v81_v9  ;;  %v36_v13 = vmul.f32 2.0, %v81_v9 }
  0x24   :  { %v37_v14 = vadd.f32 1.0, %v35_v11  ;;  %v43_v15 = vmul.f32 2.0, %v31_v10  ;;  %v47_v16 = vadd.f32 2.0, %v35_v11  ;;  %v39_v26 = vadd.f32 %v35_v11, %v31_v10 }
  0x25   :  { %v38_v17 = vadd.f32 1.0, %v36_v13  ;;  %v44_v18 = vmul.f32 2.0, %v32_v12  ;;  %v48_v19 = vadd.f32 2.0, %v36_v13  ;;  %v40_v27 = vadd.f32 %v36_v13, %v32_v12 }
  0x26   :  { %v45_v20 = vadd.f32 %v43_v15, %v37_v14  ;;  %v49_v21 = vadd.f32 %v47_v16, %v31_v10  ;;  %v41_v28 = vsel %vm33_vm0, %v37_v14, %v39_v26 }
  0x27   :  { %v46_v22 = vadd.f32 %v44_v18, %v38_v17  ;;  %v50_v23 = vadd.f32 %v48_v19, %v32_v12  ;;  %v42_v29 = vsel %vm34_vm1, %v38_v17, %v40_v27  ;;  %v53_v30 = vmul.f32 %v41_v28, %v21_v0 }
  0x28   :  { %v51_v24 = vsel %vm33_vm0, %v45_v20, %v49_v21  ;;  %v54_v31 = vmul.f32 %v42_v29, %v22_v1 }
  0x29   :  { %82 = vrcp.f32 %v51_v24  ;;  %v52_v25 = vsel %vm34_vm1, %v46_v22, %v50_v23 }
  0x2a   :  { %84 = vrcp.f32 %v52_v25 }
  0x36   :  { %v83_v32 = vpop.eup %82 }
  0x37   :  { %v85_v33 = vpop.eup %84  ;;  %v57_v34 = vmul.f32 %v83_v32, %v53_v30 }
  0x38   :  { %v58_v35 = vmul.f32 %v85_v33, %v54_v31 }
  0x39   :  { %59 = vst [vmem:[#allocation5] sm:$0xff] %v57_v34 }
  0x3a   :  { %60 = vst [vmem:[#allocation5 + $0x8] sm:$0xff] %v58_v35 }
  0x3b   :  { %117 = shalt.err (!%p114_p9)
}
  0x3c   :  { %70 = dma.vmem_to_hbm [thread:$0]  %s68_s11, 256, %s149_s1, [#allocation4]  }
  0x3d   :  { %128 = dma.done.wait [#allocation4], 256  }
  0x3e   :  { %129 = vsyncadd [#allocation4], 4294967040 }
  0x3f   :  { %74 = vsyncpa [#allocation3], 1 }
  0x40   :  { %75 = vsyncpa [#allocation4], 1 }

</bundles_post_ra>
